<compile_context>
chip_gen: v7x
topology: tpu7x:2x2x1
jax: 0.10.0
libtpu: 0.0.40
codegen_flags: <defaults>
</compile_context>

<pallas_src>
import math

import jax
import jax.numpy as jnp
from jax.experimental import pallas as pl
from jax.experimental.pallas import tpu as pltpu

_LANES = 128


def _dma_copy_kernel(x_hbm_ref, o_hbm_ref, sem):
    # One flat HBM -> HBM DMA of the whole (rows, 128) slab.  No VMEM staging,
    # no grid, no per-step overhead; a single contiguous DMA saturates HBM on
    # v5e / v6e / v7x.
    cp = pltpu.make_async_copy(x_hbm_ref, o_hbm_ref, sem)
    cp.start()
    cp.wait()


def _pallas_flat_copy(flat2d: jax.Array) -> jax.Array:
    """Materialize a copy of a (rows, 128) lane-dense array via one HBM DMA."""
    rows, lanes = flat2d.shape
    assert lanes == _LANES
    itemsize = jnp.dtype(flat2d.dtype).itemsize
    numel = rows * lanes

    return pl.pallas_call(
        _dma_copy_kernel,
        out_shape=jax.ShapeDtypeStruct((rows, _LANES), flat2d.dtype),
        in_specs=[pl.BlockSpec(memory_space=pl.ANY)],
        out_specs=pl.BlockSpec(memory_space=pl.ANY),
        scratch_shapes=[pltpu.SemaphoreType.DMA(())],
        cost_estimate=pl.CostEstimate(
            flops=0, transcendentals=0, bytes_accessed=2 * numel * itemsize
        ),
    )(flat2d)


def _resolve_size(numel: int, size):
    """Resolve a torch-style size tuple (at most one -1) against `numel`."""
    size = list(size)
    n_infer = sum(1 for s in size if s == -1)
    if n_infer > 1:
        raise ValueError("View size can have at most one -1")
    if n_infer == 1:
        idx = size.index(-1)
        known = math.prod(s for s in size if s != -1)
        # Match torch.view: refuse to infer when the known product is zero or
        # does not divide numel (previously this silently produced a bogus dim).
        if known == 0 or numel % known != 0:
            raise ValueError(
                f"cannot infer -1 dimension for size {tuple(size)} from numel {numel}"
            )
        size[idx] = numel // known
    if math.prod(size) != numel:
        raise ValueError(f"View size {tuple(size)} incompatible with numel {numel}")
    return tuple(size)


class View:
    """Reshape `x` to `size` (JAX/Pallas port of fastai's View module).

    materialize=True  -> copy through a single HBM->HBM Pallas DMA, then
                         metadata-reshape to the target size.
    materialize=False -> pure metadata reshape (zero HBM traffic), which is
                         the exact XLA equivalent of torch .view.
    """

    def __init__(self, *size: int, materialize: bool = True):
        self.size = size
        self.materialize = materialize

    def __call__(self, x: jax.Array) -> jax.Array:
        target = _resolve_size(x.size, self.size)
        numel = x.size

        # Fast path / fallback: metadata-only reshape.  Used when no copy is
        # requested, or when the flat element count is not 128-lane aligned
        # (or empty) — in those cases any copy would only add HBM traffic.
        if not self.materialize or numel == 0 or numel % _LANES != 0:
            return x.reshape(target)

        # Lane-dense staging view (metadata-only reshape; row-major order is
        # identical to torch .view on a contiguous tensor).
        rows = numel // _LANES
        flat2d = x.reshape(rows, _LANES)

        out2d = _pallas_flat_copy(flat2d)

        # Metadata-only reshape to the target size.
        return out2d.reshape(target)


if __name__ == "__main__":
    key = jax.random.PRNGKey(0)
    # Small NCHW-style input, consistent with a typical use of View in fastai:
    # flatten conv feature maps per-sample: (B, C, H, W) -> (B, C*H*W).
    x = jax.random.normal(key, (2, 4, 16, 16), dtype=jnp.float32)

    view = View(2, -1)  # reshape to (2, 1024) through the Pallas DMA path
    y = view(x)
    y = jax.block_until_ready(y)

    # Correctness check against plain JAX reshape (== torch .view semantics).
    ref = x.reshape(2, -1)
    assert y.shape == (2, 1024)
    assert y.dtype == x.dtype
    assert bool(jnp.all(y == ref))

    # Metadata-only path (review's top recommendation) gives the same result.
    y_meta = View(2, -1, materialize=False)(x)
    assert bool(jnp.all(y_meta == ref))

    # Also exercise the non-128-aligned fallback path (metadata-only reshape).
    x2 = jax.random.normal(key, (3, 5, 7), dtype=jnp.float32)
    y2 = View(5, -1)(x2)
    assert y2.shape == (5, 21)
    assert bool(jnp.all(y2 == x2.reshape(5, 21)))

    print("KERNEL_OK")
</pallas_src>

<mosaic_0001>
module attributes {stable_mosaic.version = 11 : i64} {
  func.func @_dma_copy_kernel(%arg0: memref<16x128xf32, #tpu.memory_space<any>>, %arg1: memref<16x128xf32, #tpu.memory_space<any>>, %arg2: memref<!tpu.dma_semaphore, #tpu.memory_space<semaphore_mem>>) attributes {dimension_semantics = [], scalar_prefetch = 0 : i64, scratch_operands = 1 : i64, tpu.core_type = #tpu.core_type<tc>} {
    tpu.enqueue_dma source(%arg0 : memref<16x128xf32, #tpu.memory_space<any>>) target(%arg1 : memref<16x128xf32, #tpu.memory_space<any>>) target_semaphore(%arg2 : memref<!tpu.dma_semaphore, #tpu.memory_space<semaphore_mem>>)
    tpu.wait_dma2 semaphore(%arg2 : memref<!tpu.dma_semaphore, #tpu.memory_space<semaphore_mem>>) src(%arg0 : memref<16x128xf32, #tpu.memory_space<any>>) dst(%arg1 : memref<16x128xf32, #tpu.memory_space<any>>)
    return
  }
}

</mosaic_0001>

<bundles_post_ra>
// kernel: tpu_custom_call.1
= control target key start
LH: loop header
LB: loop body
LE: loop exit
PB: predicated region body
PF: predicated region fallthrough
CT: control target
= control target key end

     0   :  { %s34_s6 = smov [#allocation2]   ;;  %s35_s7 = smov [#allocation3]   ;;  %s53_s0 = inlined_call_operand.hbm [shape: f32[16,128], index: 0, kind: input, shape index: {}]   ;;  %s54_s1 = inlined_call_operand.hbm [shape: f32[16,128], index: 1, kind: output, shape index: {}]  }
   0x1   :  { %s36_s8 = smov 0  }
   0x2   :  { %18 = dma.general %s53_s0, 256, %s54_s1, %s34_s6, %s35_s7, [#allocation4], %s36_s8, 0  }
   0x3   :  { %32 = dma.done.wait [#allocation2], 256 }
   0x4   :  { %33 = vsyncadd [#allocation2], 4294967040 }
   0x5   :  { %22 = vsyncmov [#allocation2] }
   0x8   :  { %s23_s13 = vpop.sfrf %22 }
   0x9   :  { %p28_p0 = scmp.ne.s32.totalorder %s23_s13, 0 }
   0xb   :  { %27 = shalt.err (%p28_p0)  }

</bundles_post_ra>
